<compile_context>
chip_gen: v7x
topology: tpu7x:2x2x1
jax: 0.10.0
libtpu: 0.0.40
codegen_flags: <defaults>
</compile_context>

<pallas_src>
import functools
import math

import jax
import jax.numpy as jnp
from jax.experimental import pallas as pl
from jax.experimental.pallas import tpu as pltpu


def _label_smoothing_kernel(outputs_ref, aux_ref, targets_ref,
                            loss_ref, count_ref, *,
                            s_sum, s_log_sum, pad_index, num_rows):
    """One token tile of log_softmax + smoothed KLDiv(sum), accumulated into loss_ref.

    aux_ref rows: [0] smoothing row st (zero at col 0 and pad col),
                  [1] corr_a, [2] corr_b  (row-0 scatter correction, see wrapper).
    """
    i = pl.program_id(0)
    ts, _ = outputs_ref.shape

    # Logits tile, upcast to f32 in-kernel (HBM may hold bf16).
    x = outputs_ref[...].astype(jnp.float32)                          # (ts, V)

    # Only the pieces of log_softmax we actually need: shifted logits + LSE.
    m = jnp.max(x, axis=-1, keepdims=True)                            # (ts, 1)
    shifted = x - m                                                   # (ts, V)
    lse = jnp.log(jnp.sum(jnp.exp(shifted), axis=-1, keepdims=True))  # (ts, 1)

    # KLDiv(reduction='sum') against the uniform smoothing row, factored so no
    # (ts, V) logp / kl tensor is ever built:
    #   row_loss[r] = s_log_sum - sum_v st[v]*shifted[r,v] + s_sum*lse[r]
    st_row = aux_ref[0:1, :]                                          # (1, V)
    wdot = jnp.sum(shifted * st_row, axis=-1, keepdims=True)          # (ts, 1)
    row_loss = s_log_sum - wdot + s_sum * lse                         # (ts, 1)

    # Mask rows past the true number of tokens (partial last tile).  Garbage
    # rows may be NaN/Inf; jnp.where is a select so they never propagate.
    row_ids = i * ts + jax.lax.broadcasted_iota(jnp.int32, (ts, 1), 0)
    row_loss = jnp.where(row_ids < num_rows, row_loss, 0.0)

    @pl.when(i == 0)
    def _init():
        # count = (targets != pad_index).sum()
        count_ref[...] = jnp.sum(
            (targets_ref[...] != pad_index).astype(jnp.int32), keepdims=True)

        # Row-0 scatter correction: the as-written scatter_ with a (1, S) index
        # writes `confidence` into row 0 only, at every id appearing in the
        # target sequence; column 0 is zeroed afterwards.  With the per-column
        # constants corr_a/corr_b precomputed in the wrapper this is a single
        # (1, V) fused multiply-add + reduce, executed once.
        logp0 = shifted[0:1, :] - lse[0:1, :]                         # (1, V)
        corr_a = aux_ref[1:2, :]                                      # (1, V)
        corr_b = aux_ref[2:3, :]                                      # (1, V)
        loss_ref[...] = jnp.sum(corr_a - corr_b * logp0, keepdims=True)

    loss_ref[...] += jnp.sum(row_loss, keepdims=True)                 # f32 accumulation


def _choose_tile_rows(num_tokens, vocab):
    """Largest 8-aligned token tile whose f32 working set is ~4 MiB.

    Keeps the double-buffered input block + the few in-kernel f32 temporaries
    comfortably inside the scoped VMEM budget (v7x has half the VMEM of v6e).
    """
    ts = (4 * 1024 * 1024) // (vocab * 4)
    ts = max(8, (ts // 8) * 8)
    ts = min(ts, 1024)
    if ts >= num_tokens:
        return num_tokens          # single full-height block
    return ts


def label_smoothing_loss(outputs, targets, *, label_smoothing, pad_index=0):
    """outputs: (B, S, V) float32/bfloat16 logits, targets: (B, S) ints.

    Returns (loss, count) matching the as-written PyTorch forward (B == 1).
    """
    B, S, V = outputs.shape
    assert B == 1, "reference semantics are only well-defined for batch_size == 1"
    assert 0.0 < label_smoothing <= 1.0

    sv = float(label_smoothing) / (V - 2)          # smoothing_value
    conf = 1.0 - float(label_smoothing)            # confidence
    log_s = math.log(sv)
    log_c = math.log(conf) if conf > 0.0 else 0.0

    # Number of non-zero entries in the smoothing row (col 0 and pad col zeroed).
    nnz = V - 1 if int(pad_index) == 0 else V - 2
    s_sum = nnz * sv                               # sum_v st[v]
    s_log_sum = s_sum * log_s                      # sum_v st[v]*log st[v]

    n = B * S
    outputs_2d = outputs.reshape(n, V)                     # keep HBM dtype (bf16 ok)
    targets_row = targets.reshape(1, n).astype(jnp.int32)

    # --- tiny O(V)/O(S) precompute in the wrapper (done once, off the hot path) ---
    col = jnp.arange(V, dtype=jnp.int32)
    st_row = jnp.where((col == 0) | (col == pad_index), 0.0, sv).astype(jnp.float32)
    member = jnp.zeros((V,), jnp.bool_).at[targets.reshape(-1)].set(True)
    fix = member & (col != 0)                              # columns overwritten in row 0
    # correction[c] = fix[c] * (conf*(log_c - logp0[c]) - st[c]*(log_s - logp0[c]))
    #              = corr_a[c] - corr_b[c] * logp0[c]
    corr_a = jnp.where(fix, conf * log_c - st_row * log_s, 0.0).astype(jnp.float32)
    corr_b = jnp.where(fix, conf - st_row, 0.0).astype(jnp.float32)
    aux = jnp.stack([st_row, corr_a, corr_b], axis=0)      # (3, V) resident block

    ts = _choose_tile_rows(n, V)
    grid = (pl.cdiv(n, ts),)

    kernel = functools.partial(
        _label_smoothing_kernel,
        s_sum=s_sum, s_log_sum=s_log_sum,
        pad_index=int(pad_index), num_rows=n,
    )

    itemsize = jnp.dtype(outputs_2d.dtype).itemsize
    cost = pl.CostEstimate(
        flops=6 * n * V,
        transcendentals=n * V,
        bytes_accessed=n * V * itemsize + 12 * V + 4 * n + 8,
    )

    loss, count = pl.pallas_call(
        kernel,
        grid=grid,
        in_specs=[
            pl.BlockSpec((ts, V), lambda i: (i, 0)),       # logits: tiled, pipelined
            pl.BlockSpec((3, V), lambda i: (0, 0)),        # st/corr_a/corr_b: resident
            pl.BlockSpec((1, n), lambda i: (0, 0)),        # targets: resident, lane-dense
        ],
        out_specs=(
            pl.BlockSpec((1, 1), lambda i: (0, 0)),        # loss accumulator (resident)
            pl.BlockSpec((1, 1), lambda i: (0, 0)),        # pad count
        ),
        out_shape=(
            jax.ShapeDtypeStruct((1, 1), jnp.float32),
            jax.ShapeDtypeStruct((1, 1), jnp.int32),
        ),
        compiler_params=pltpu.CompilerParams(
            dimension_semantics=("arbitrary",),            # accumulator across the grid
            vmem_limit_bytes=32 * 1024 * 1024,
        ),
        cost_estimate=cost,
    )(outputs_2d, aux, targets_row)
    return loss[0, 0], count[0, 0]


def _reference(outputs, targets, *, label_smoothing, pad_index):
    """Pure-JAX reference of the as-written PyTorch forward (B == 1)."""
    B, S, V = outputs.shape
    logp = jax.nn.log_softmax(outputs.astype(jnp.float32), axis=-1).reshape(B * S, V)
    sv = label_smoothing / (V - 2)
    conf = 1.0 - label_smoothing
    base = jnp.full((V,), sv, jnp.float32).at[pad_index].set(0.0)
    st = jnp.tile(base[None, :], (S, 1))
    st = st.at[0, targets.reshape(B, S)[0]].set(conf)   # scatter_(1, (1,S) idx, conf)
    st = st.at[:, 0].set(0.0)
    safe = jnp.where(st > 0, st, 1.0)
    ref_loss = jnp.sum(st * (jnp.log(safe) - logp))
    ref_count = jnp.sum(targets != pad_index)
    return ref_loss, ref_count


if __name__ == "__main__":
    key = jax.random.PRNGKey(0)
    label_smoothing = 0.1
    pad_index = 0  # SPECIAL_TOKENS_INDEX[PAD_TOKEN] assumed 0 (PAD is index 0)

    # Case 1: small single-tile shape.
    # Case 2: multi-tile with a partial last tile (exercises pipelining + masking).
    for (B, S, V) in [(1, 8, 32), (1, 1200, 32)]:
        k1, k2 = jax.random.split(jax.random.fold_in(key, S))
        outputs = jax.random.normal(k1, (B, S, V), dtype=jnp.float32)
        targets = jax.random.randint(k2, (B, S), 0, V, dtype=jnp.int32)

        loss, count = label_smoothing_loss(
            outputs, targets, label_smoothing=label_smoothing, pad_index=pad_index)
        loss, count = jax.block_until_ready((loss, count))

        ref_loss, ref_count = _reference(
            outputs, targets, label_smoothing=label_smoothing, pad_index=pad_index)

        assert jnp.allclose(loss, ref_loss, rtol=1e-5, atol=1e-4), (S, loss, ref_loss)
        assert int(count) == int(ref_count), (S, int(count), int(ref_count))

    print("KERNEL_OK")
</pallas_src>

<mosaic_0001>
module attributes {stable_mosaic.version = 11 : i64} {
  func.func @_label_smoothing_kernel(%arg0: i32, %arg1: memref<8x32xf32, #tpu.memory_space<vmem>>, %arg2: memref<3x32xf32, #tpu.memory_space<vmem>>, %arg3: memref<1x8xi32, #tpu.memory_space<vmem>>, %arg4: memref<1x1xf32, #tpu.memory_space<vmem>>, %arg5: memref<1x1xi32, #tpu.memory_space<vmem>>) attributes {dimension_semantics = [#tpu.dimension_semantics<arbitrary>], iteration_bounds = array<i64: 1>, scalar_prefetch = 0 : i64, scratch_operands = 0 : i64, tpu.core_type = #tpu.core_type<tc>, window_params = [{transform_indices = @transform_0, window_bounds = array<i64: 8, 32>}, {pipeline_mode = #tpu.pipeline_mode<synchronous>, transform_indices = @transform_1, window_bounds = array<i64: 3, 32>}, {pipeline_mode = #tpu.pipeline_mode<synchronous>, transform_indices = @transform_2, window_bounds = array<i64: 1, 8>}, {pipeline_mode = #tpu.pipeline_mode<synchronous>, transform_indices = @transform_3, window_bounds = array<i64: 1, 1>}, {pipeline_mode = #tpu.pipeline_mode<synchronous>, transform_indices = @transform_4, window_bounds = array<i64: 1, 1>}]} {
    %c0 = arith.constant 0 : index
    %c0_0 = arith.constant 0 : index
    %0 = vector.load %arg1[%c0, %c0_0] : memref<8x32xf32, #tpu.memory_space<vmem>>, vector<8x32xf32>
    %cst = arith.constant dense<0xFF800000> : vector<8xf32>
    %1 = vector.multi_reduction <maximumf>, %0, %cst [1] : vector<8x32xf32> to vector<8xf32>
    %2 = vector.shape_cast %1 : vector<8xf32> to vector<8x1xf32>
    %3 = vector.broadcast %2 : vector<8x1xf32> to vector<8x32xf32>
    %4 = arith.subf %0, %3 : vector<8x32xf32>
    %5 = math.exp %4 : vector<8x32xf32>
    %cst_1 = arith.constant dense<0.000000e+00> : vector<8xf32>
    %6 = vector.multi_reduction <add>, %5, %cst_1 [1] : vector<8x32xf32> to vector<8xf32>
    %7 = vector.shape_cast %6 : vector<8xf32> to vector<8x1xf32>
    %8 = math.log %7 : vector<8x1xf32>
    %c0_2 = arith.constant 0 : index
    %c0_3 = arith.constant 0 : index
    %9 = vector.load %arg2[%c0_2, %c0_3] : memref<3x32xf32, #tpu.memory_space<vmem>>, vector<1x32xf32>
    %10 = vector.broadcast %9 : vector<1x32xf32> to vector<8x32xf32>
    %11 = arith.mulf %4, %10 : vector<8x32xf32>
    %cst_4 = arith.constant dense<0.000000e+00> : vector<8xf32>
    %12 = vector.multi_reduction <add>, %11, %cst_4 [1] : vector<8x32xf32> to vector<8xf32>
    %13 = vector.shape_cast %12 : vector<8xf32> to vector<8x1xf32>
    %cst_5 = arith.constant -0.589390874 : f32
    %14 = vector.broadcast %cst_5 : f32 to vector<8x1xf32>
    %15 = arith.subf %14, %13 : vector<8x1xf32>
    %cst_6 = arith.constant 0.103333332 : f32
    %16 = vector.broadcast %cst_6 : f32 to vector<8x1xf32>
    %17 = arith.mulf %16, %8 : vector<8x1xf32>
    %18 = arith.addf %15, %17 : vector<8x1xf32>
    %c8_i32 = arith.constant 8 : i32
    %19 = arith.muli %arg0, %c8_i32 : i32
    %20 = tpu.iota {dimensions = array<i32: 0>} : vector<8x1xi32>
    %21 = vector.broadcast %19 : i32 to vector<8x1xi32>
    %22 = arith.addi %21, %20 : vector<8x1xi32>
    %c8_i32_7 = arith.constant 8 : i32
    %23 = vector.broadcast %c8_i32_7 : i32 to vector<8x1xi32>
    %24 = arith.cmpi slt, %22, %23 : vector<8x1xi32>
    %cst_8 = arith.constant 0.000000e+00 : f32
    %25 = vector.broadcast %cst_8 : f32 to vector<8x1xf32>
    %26 = arith.select %24, %18, %25 : vector<8x1xi1>, vector<8x1xf32>
    %c0_i32 = arith.constant 0 : i32
    %27 = arith.cmpi eq, %arg0, %c0_i32 : i32
    %28 = arith.extui %27 : i1 to i32
    %c0_i32_9 = arith.constant 0 : i32
    %29 = arith.cmpi ne, %28, %c0_i32_9 : i32
    scf.if %29 {
      %c0_15 = arith.constant 0 : index
      %c0_16 = arith.constant 0 : index
      %38 = vector.load %arg3[%c0_15, %c0_16] : memref<1x8xi32, #tpu.memory_space<vmem>>, vector<1x8xi32>
      %c0_i32_17 = arith.constant 0 : i32
      %39 = vector.broadcast %c0_i32_17 : i32 to vector<1x8xi32>
      %40 = arith.cmpi ne, %38, %39 : vector<1x8xi32>
      %41 = arith.extui %40 : vector<1x8xi1> to vector<1x8xi32>
      %42 = vector.shape_cast %41 : vector<1x8xi32> to vector<1x1x8xi32>
      %cst_18 = arith.constant dense<0> : vector<1xi32>
      %43 = vector.multi_reduction <add>, %42, %cst_18 [1, 2] : vector<1x1x8xi32> to vector<1xi32>
      %44 = vector.shape_cast %43 : vector<1xi32> to vector<1x1x1xi32>
      %45 = vector.extract %44[0, 0, 0] : i32 from vector<1x1x1xi32>
      %46 = vector.broadcast %45 : i32 to vector<1x1xi32>
      %c0_19 = arith.constant 0 : index
      %c0_20 = arith.constant 0 : index
      %47 = vector.load %arg5[%c0_19, %c0_20] : memref<1x1xi32, #tpu.memory_space<vmem>>, vector<1x1xi32>
      tpu.vector_store %arg5[%c0_19, %c0_20], %46 {strides = array<i32>} : memref<1x1xi32, #tpu.memory_space<vmem>>, vector<1x1xi32>,
      %48 = vector.extract_strided_slice %4 {offsets = [0, 0], sizes = [1, 32], strides = [1, 1]} : vector<8x32xf32> to vector<1x32xf32>
      %49 = vector.extract_strided_slice %8 {offsets = [0, 0], sizes = [1, 1], strides = [1, 1]} : vector<8x1xf32> to vector<1x1xf32>
      %50 = vector.broadcast %49 : vector<1x1xf32> to vector<1x32xf32>
      %51 = arith.subf %48, %50 : vector<1x32xf32>
      %c1 = arith.constant 1 : index
      %c0_21 = arith.constant 0 : index
      %52 = vector.load %arg2[%c1, %c0_21] : memref<3x32xf32, #tpu.memory_space<vmem>>, vector<1x32xf32>
      %c2 = arith.constant 2 : index
      %c0_22 = arith.constant 0 : index
      %53 = vector.load %arg2[%c2, %c0_22] : memref<3x32xf32, #tpu.memory_space<vmem>>, vector<1x32xf32>
      %54 = arith.mulf %53, %51 : vector<1x32xf32>
      %55 = arith.subf %52, %54 : vector<1x32xf32>
      %56 = vector.shape_cast %55 : vector<1x32xf32> to vector<1x1x32xf32>
      %cst_23 = arith.constant dense<0.000000e+00> : vector<1xf32>
      %57 = vector.multi_reduction <add>, %56, %cst_23 [1, 2] : vector<1x1x32xf32> to vector<1xf32>
      %58 = vector.shape_cast %57 : vector<1xf32> to vector<1x1x1xf32>
      %59 = vector.extract %58[0, 0, 0] : f32 from vector<1x1x1xf32>
      %60 = vector.broadcast %59 : f32 to vector<1x1xf32>
      %c0_24 = arith.constant 0 : index
      %c0_25 = arith.constant 0 : index
      %61 = vector.load %arg4[%c0_24, %c0_25] : memref<1x1xf32, #tpu.memory_space<vmem>>, vector<1x1xf32>
      tpu.vector_store %arg4[%c0_24, %c0_25], %60 {strides = array<i32>} : memref<1x1xf32, #tpu.memory_space<vmem>>, vector<1x1xf32>,
    } else {
    }
    %c0_10 = arith.constant 0 : index
    %c0_11 = arith.constant 0 : index
    %30 = vector.load %arg4[%c0_10, %c0_11] : memref<1x1xf32, #tpu.memory_space<vmem>>, vector<1x1xf32>
    %31 = vector.shape_cast %26 : vector<8x1xf32> to vector<1x8x1xf32>
    %cst_12 = arith.constant dense<0.000000e+00> : vector<1xf32>
    %32 = vector.multi_reduction <add>, %31, %cst_12 [1, 2] : vector<1x8x1xf32> to vector<1xf32>
    %33 = vector.shape_cast %32 : vector<1xf32> to vector<1x1x1xf32>
    %34 = vector.extract %33[0, 0, 0] : f32 from vector<1x1x1xf32>
    %35 = vector.broadcast %34 : f32 to vector<1x1xf32>
    %36 = arith.addf %30, %35 : vector<1x1xf32>
    %c0_13 = arith.constant 0 : index
    %c0_14 = arith.constant 0 : index
    %37 = vector.load %arg4[%c0_13, %c0_14] : memref<1x1xf32, #tpu.memory_space<vmem>>, vector<1x1xf32>
    tpu.vector_store %arg4[%c0_13, %c0_14], %36 {strides = array<i32>} : memref<1x1xf32, #tpu.memory_space<vmem>>, vector<1x1xf32>,
    return
  }
  func.func @transform_0(%arg0: i32) -> (i32, i32) {
    %c0_i32 = arith.constant 0 : i32
    %c0_i32_0 = arith.constant 0 : i32
    return %arg0, %c0_i32 : i32, i32
  }
  func.func @transform_1(%arg0: i32) -> (i32, i32) {
    %c0_i32 = arith.constant 0 : i32
    %c0_i32_0 = arith.constant 0 : i32
    %c0_i32_1 = arith.constant 0 : i32
    return %c0_i32, %c0_i32_0 : i32, i32
  }
  func.func @transform_2(%arg0: i32) -> (i32, i32) {
    %c0_i32 = arith.constant 0 : i32
    %c0_i32_0 = arith.constant 0 : i32
    %c0_i32_1 = arith.constant 0 : i32
    return %c0_i32, %c0_i32_0 : i32, i32
  }
  func.func @transform_3(%arg0: i32) -> (i32, i32) {
    %c0_i32 = arith.constant 0 : i32
    %c0_i32_0 = arith.constant 0 : i32
    %c0_i32_1 = arith.constant 0 : i32
    return %c0_i32, %c0_i32_0 : i32, i32
  }
  func.func @transform_4(%arg0: i32) -> (i32, i32) {
    %c0_i32 = arith.constant 0 : i32
    %c0_i32_0 = arith.constant 0 : i32
    %c0_i32_1 = arith.constant 0 : i32
    return %c0_i32, %c0_i32_0 : i32, i32
  }
}

</mosaic_0001>

<bundles_post_ra>
// kernel: tpu_custom_call.1
= control target key start
LH: loop header
LB: loop body
LE: loop exit
PB: predicated region body
PF: predicated region fallthrough
CT: control target
= control target key end

     0   :  { %10 = vsyncpa [#allocation3], 0  ;;  %s365_s0 = inlined_call_operand.hbm [shape: f32[8,32], index: 0, kind: input, shape index: {}]   ;;  %s366_s1 = inlined_call_operand.hbm [shape: f32[3,32], index: 1, kind: input, shape index: {}]   ;;  %s367_s2 = inlined_call_operand.vmem [shape: s32[1,8], index: 2, kind: input, shape index: {}]   ;;  %s368_s3 = inlined_call_operand.hbm [shape: f32[1,1], index: 3, kind: output, shape index: {0}]   ;;  %s369_s4 = inlined_call_operand.hbm [shape: s32[1,1], index: 4, kind: output, shape index: {1}]  }
   0x1   :  { %11 = vsyncpa [#allocation6], 0 }
   0x2   :  { %12 = vsyncpa [#allocation4], 0 }
   0x3   :  { %13 = vsyncpa [#allocation9], 0  ;;  %s281_s15 = smov [#allocation2]   ;;  %s282_s17 = smov [#allocation5]  }
   0x4   :  { %s20_s16 = sshll.u32 %s281_s15, 4  ;;  %s30_s18 = sshll.u32 %s282_s17, 4  ;;  %s21_s16 = int_to_ptr.vmem [resolvable:$true] %s20_s16  ;;  %s31_s18 = int_to_ptr.vmem [resolvable:$true] %s30_s18 }
   0x5   :  { %s185_s21 = scalar_lea.hbm %s365_s0, 128 }
   0x6   :  { %p186_p0 = scmp.ne.s32.totalorder %s365_s0, %s185_s21  ;;  %p189_p1 = scmp.lt.u32.totalorder %s185_s21, %s365_s0 }
   0x8   :  { %p191_p2 = pnand %p189_p1, %p186_p0 }
   0xa   :  { %194 = shalt.err (!%p191_p2)
}
   0xb   :  { %s195_s26 = scalar_lea.vmem %s21_s16, 128  ;;  %p200_p4 = scmp.lt.s32.totalorder %s21_s16, %s21_s16 }
   0xc   :  { %p196_p3 = scmp.ne.s32.totalorder %s21_s16, %s195_s26  ;;  %p201_p5 = scmp.lt.s32.totalorder %s195_s26, %s195_s26 }
   0xe   :  { %p202_p6 = por %p201_p5, %p200_p4 }
  0x10   :  { %p203_p7 = pnand %p202_p6, %p196_p3 }
  0x12   :  { %206 = shalt.err (!%p203_p7)
}
  0x13   :  { %23 = dma.hbm_to_vmem [thread:$0]  %s365_s0, 128, %s21_s16, [#allocation3]  }
  0x14   :  { %s207_s5 = scalar_lea.hbm %s366_s1, 64 }
  0x15   :  { %p208_p8 = scmp.ne.s32.totalorder %s366_s1, %s207_s5  ;;  %p211_p9 = scmp.lt.u32.totalorder %s207_s5, %s366_s1 }
  0x17   :  { %p213_p10 = pnand %p211_p9, %p208_p8 }
  0x19   :  { %216 = shalt.err (!%p213_p10)
}
  0x1a   :  { %s217_s10 = scalar_lea.vmem %s31_s18, 64  ;;  %p222_p12 = scmp.lt.s32.totalorder %s31_s18, %s31_s18 }
  0x1b   :  { %p218_p11 = scmp.ne.s32.totalorder %s31_s18, %s217_s10  ;;  %p223_p13 = scmp.lt.s32.totalorder %s217_s10, %s217_s10 }
  0x1d   :  { %p224_p0 = por %p223_p13, %p222_p12 }
  0x1f   :  { %p225_p1 = pnand %p224_p0, %p218_p11 }
  0x21   :  { %228 = shalt.err (!%p225_p1)
}
  0x22   :  { %33 = dma.hbm_to_vmem [thread:$0]  %s366_s1, 64, %s31_s18, [#allocation6]  }
  0x23   :  { %273 = dma.done.wait [#allocation3], 128  }
  0x24   :  { %274 = vsyncadd [#allocation3], 4294967168 }
  0x25   :  { %275 = dma.done.wait [#allocation6], 64  }
  0x26   :  { %276 = vsyncadd [#allocation6], 4294967232  ;;  %vm43_vm0 = vcmask 261120   ;;  %v42_v0 = vld [vmem:[#allocation2] sm:$0xff]  ;;  %v169_v3 = vld [vmem:[#allocation5] ss:$0 sm:$0xff] }
  0x27   :  { %v44_v1 = vsel %vm43_vm0, %v42_v0, -inf  ;;  %v78_v10 = vld [vmem:[%s367_s2] sm:$0x1]  ;;  %v283_v11 = vmov 0   ;;  %vm81_vm2 = vcmask 57344   ;;  %vm124_vm3 = vcmask 7168  }
  0x28   :  { %45 = vmax.xlane.f32.xlu0 %v44_v1  ;;  %vm79_vm1 = vcmp.ne.s32.totalorder %v78_v10, 0  ;;  %v107_v22 = vld [vmem:[#allocation5 + $0x2] sm:$0x1]  ;;  %v106_v26 = vld [vmem:[#allocation5 + $0x1] sm:$0x1]  ;;  %vm110_vm4 = vcmask 253952  }
  0x29   :  { %v80_v12 = vsel %vm79_vm1, 1, %v283_v11  ;;  %vm103_vm5 = vcmask 0   ;;  %s284_s13 = smov [#allocation8]  }
  0x2a   :  { %v82_v13 = vsel %vm81_vm2, %v80_v12, 0  ;;  %s155_s14 = sshll.u32 %s284_s13, 4  ;;  %s156_s14 = int_to_ptr.vmem [resolvable:$true] %s155_s14 }
  0x2b   :  { %v84_v14 = vshrl.u32 %v82_v13, 16  ;;  %v83_v16 = vand.u32 65535, %v82_v13  ;;  %s229_s15 = scalar_lea.vmem %s156_s14, 16  ;;  %s233_s16 = scalar_lea.vmem %s156_s14, 32 }
  0x2c   :  { %p230_p2 = scmp.ne.s32.totalorder %s156_s14, %s229_s15  ;;  %p234_p3 = scmp.lt.s32.totalorder %s156_s14, %s156_s14 }
  0x2d   :  { %v86_v15 = vcvt.s32.f32 %v84_v14  ;;  %v85_v17 = vcvt.s32.f32 %v83_v16  ;;  %p235_p4 = scmp.lt.s32.totalorder %s233_s16, %s229_s15 }
  0x2f   :  { %p236_p5 = por %p235_p4, %p234_p3 }
  0x31   :  { %p237_p6 = pnand %p236_p5, %p230_p2 }
  0xb5   :  { %v46_v2 = vpop.xlane.xlu0 %45 }
  0xb6   :  { %v47_v4 = vsub.f32 %v42_v0, %v46_v2 }
  0xb8   :  { %v48_v5 = vmul.f32 1.442695, %v47_v4  ;;  %v60_v6 = vmul.f32 %v169_v3, %v47_v4 }
  0xba   :  { %181 = vpow2.f32 %v48_v5  ;;  %v61_v7 = vsel %vm43_vm0, %v60_v6, 0.0 }
  0xbb   :  { %62 = vadd.xlane.f32.xlu1 %v61_v7 }
  0xbf   :  { %89 = vadd.xlane.f32.xlu1 %v86_v15 }
  0xc4   :  { %v182_v8 = vpop.eup %181 }
  0xc5   :  { %v50_v9 = vsel %vm43_vm0, %v182_v8, 0.0 }
  0xc6   :  { %51 = vadd.xlane.f32.xlu0 %v50_v9 }
  0xca   :  { %87 = vadd.xlane.f32.xlu0 %v85_v17 }
 0x148   :  { %v63_v20 = vpop.xlane.xlu1 %62 }
 0x149   :  { %v64_v23 = vsub.f32 -0.5893909, %v63_v20 }
 0x14c   :  { %v90_v32 = vpop.xlane.xlu1 %89 }
 0x14d   :  { %v92_v33 = vcvt.f32.s32 %v90_v32 }
 0x14f   :  { %v93_v35 = vshll.u32 %v92_v33, 16 }
 0x153   :  { %v52_v18 = vpop.xlane.xlu0 %51 }
 0x154   :  { %183 = vlog2.f32 %v52_v18 }
 0x157   :  { %v88_v34 = vpop.xlane.xlu0 %87 }
 0x158   :  { %v91_v36 = vcvt.f32.s32 %v88_v34 }
 0x15a   :  { %v94_v37 = vadd.s32 %v93_v35, %v91_v36 }
 0x15c   :  { %v95_v38 = vrot.slane %v94_v37, 4 }
 0x15e   :  { %v184_v19 = vpop.eup %183  ;;  %v96_v39 = vadd.s32 %v95_v38, %v94_v37 }
 0x15f   :  { %v54_v21 = vmul.f32 0.6931472, %v184_v19 }
 0x160   :  { %v97_v40 = vrot.slane %v96_v39, 2 }
 0x161   :  { %v105_v24 = vsub.f32 %v47_v4, %v54_v21  ;;  %v65_v25 = vmul.f32 0.10333333, %v54_v21 }
 0x162   :  { %v98_v41 = vadd.s32 %v97_v40, %v96_v39 }
 0x163   :  { %v66_v27 = vadd.f32 %v65_v25, %v64_v23  ;;  %v108_v28 = vmul.f32 %v107_v22, %v105_v24 }
 0x164   :  { %v99_v42 = vrot.slane %v98_v41, 1 }
 0x165   :  { %v125_v29 = vsel %vm124_vm3, %v66_v27, 0.0  ;;  %v109_v30 = vsub.f32 %v106_v26, %v108_v28 }
 0x166   :  { %126 = vadd.xlane.f32.xlu0 %v125_v29  ;;  %v100_v43 = vadd.s32 %v99_v42, %v98_v41 }
 0x167   :  { %v111_v31 = vsel %vm110_vm4, %v109_v30, 0.0 }
 0x168   :  { %112 = vadd.xlane.f32.xlu1 %v111_v31  ;;  %170 = vpush %v100_v43 }
 0x199   :  { %s171_s2 = spop %170 }
 0x19a   :  { %v102_v44 = vstv %s171_s2 }
 0x19b   :  { %104 = vst.msk [vmem:[#allocation8] sm:$0x1] %vm103_vm5, %v102_v44 }
 0x19c   :  { %240 = shalt.err (!%p237_p6)
}
 0x19d   :  { %s241_s19 = scalar_lea.hbm %s369_s4, 16 }
 0x19e   :  { %p242_p7 = scmp.ne.s32.totalorder %s369_s4, %s241_s19  ;;  %p245_p8 = scmp.lt.u32.totalorder %s241_s19, %s369_s4 }
 0x1a0   :  { %p247_p9 = pnand %p245_p8, %p242_p7 }
 0x1a2   :  { %250 = shalt.err (!%p247_p9)
}
 0x1a3   :  { %158 = dma.vmem_to_hbm [thread:$0]  %s156_s14, 16, %s369_s4, [#allocation9]  }
 0x1a4   :  { %s285_s27 = smov [#allocation7]  }
 0x1a5   :  { %s145_s28 = sshll.u32 %s285_s27, 4  ;;  %s146_s28 = int_to_ptr.vmem [resolvable:$true] %s145_s28 }
 0x1a6   :  { %s251_s29 = scalar_lea.vmem %s146_s28, 16  ;;  %s255_s30 = scalar_lea.vmem %s146_s28, 32 }
 0x1a7   :  { %p252_p10 = scmp.ne.s32.totalorder %s146_s28, %s251_s29  ;;  %p256_p11 = scmp.lt.s32.totalorder %s146_s28, %s146_s28 }
 0x1a8   :  { %p257_p12 = scmp.lt.s32.totalorder %s255_s30, %s251_s29 }
 0x1aa   :  { %p258_p13 = por %p257_p12, %p256_p11 }
 0x1ac   :  { %p259_p0 = pnand %p258_p13, %p252_p10 }
 0x1f3   :  { %v127_v45 = vpop.xlane.xlu0 %126 }
 0x1f4   :  { %v128_v46 = vrot.slane %v127_v45, 4 }
 0x1f5   :  { %v113_v47 = vpop.xlane.xlu1 %112 }
 0x1f6   :  { %v129_v48 = vadd.f32 %v128_v46, %v127_v45  ;;  %v114_v49 = vrot.slane %v113_v47, 4 }
 0x1f8   :  { %v130_v50 = vrot.slane %v129_v48, 2  ;;  %v115_v51 = vadd.f32 %v114_v49, %v113_v47 }
 0x1fa   :  { %v131_v52 = vadd.f32 %v130_v50, %v129_v48  ;;  %v116_v53 = vrot.slane %v115_v51, 2 }
 0x1fc   :  { %v117_v54 = vadd.f32 %v116_v53, %v115_v51  ;;  %v132_v55 = vrot.slane %v131_v52, 1 }
 0x1fe   :  { %v118_v56 = vrot.slane %v117_v54, 1  ;;  %v133_v58 = vadd.f32 %v132_v55, %v131_v52 }
 0x200   :  { %v119_v57 = vadd.f32 %v118_v56, %v117_v54 }
 0x202   :  { %172 = vpush %v119_v57 }
 0x203   :  { %174 = vpush %v133_v58 }
 0x233   :  { %s173_s26 = spop %172 }
 0x234   :  { %v121_v59 = vstv %s173_s26  ;;  %s175_s4 = spop %174 }
 0x235   :  { %122 = vst.msk [vmem:[#allocation7] sm:$0x1] %vm103_vm5, %v121_v59  ;;  %v135_v61 = vstv %s175_s4 }
 0x23c   :  { %v123_v60 = vld [vmem:[#allocation7] sm:$0x1] }
 0x23d   :  { %v136_v62 = vadd.f32 %v135_v61, %v123_v60 }
 0x23f   :  { %138 = vst.msk [vmem:[#allocation7] sm:$0x1] %vm103_vm5, %v136_v62 }
 0x240   :  { %262 = shalt.err (!%p259_p0)
}
 0x241   :  { %s263_s7 = scalar_lea.hbm %s368_s3, 16 }
 0x242   :  { %p264_p1 = scmp.ne.s32.totalorder %s368_s3, %s263_s7  ;;  %p267_p2 = scmp.lt.u32.totalorder %s263_s7, %s368_s3 }
 0x244   :  { %p269_p3 = pnand %p267_p2, %p264_p1 }
 0x246   :  { %272 = shalt.err (!%p269_p3)
}
 0x247   :  { %148 = dma.vmem_to_hbm [thread:$0]  %s146_s28, 16, %s368_s3, [#allocation4]  }
 0x248   :  { %277 = dma.done.wait [#allocation4], 16  }
 0x249   :  { %278 = vsyncadd [#allocation4], 4294967280 }
 0x24a   :  { %279 = dma.done.wait [#allocation9], 16  }
 0x24b   :  { %280 = vsyncadd [#allocation9], 4294967280 }
 0x24c   :  { %165 = vsyncpa [#allocation3], 1 }
 0x24d   :  { %166 = vsyncpa [#allocation6], 1 }
 0x24e   :  { %167 = vsyncpa [#allocation4], 1 }
 0x24f   :  { %168 = vsyncpa [#allocation9], 1 }

</bundles_post_ra>
